<compile_context>
chip_gen: v7x
topology: tpu7x:2x2x1
jax: 0.10.0
libtpu: 0.0.40
codegen_flags: <defaults>
</compile_context>

<pallas_src>
import jax
import jax.numpy as jnp
from jax.experimental import pallas as pl
from jax.experimental.pallas import tpu as pltpu

EPS = 1e-5
_VMEM_LIMIT = 32 * 1024 * 1024  # raise scoped VMEM (v5e default is 16 MiB)


# --------------------------- in-kernel helpers ---------------------------
def _zero_halo(pad_ref, H2, W2, C):
    """Zero only the 1-pixel border of the padded scratch (not the interior)."""
    zrow = jnp.zeros((1, W2 + 2, C), pad_ref.dtype)
    pad_ref[0:1, :, :] = zrow
    pad_ref[H2 + 1:H2 + 2, :, :] = zrow
    zcol = jnp.zeros((H2 + 2, 1, C), pad_ref.dtype)
    pad_ref[:, 0:1, :] = zcol
    pad_ref[:, W2 + 1:W2 + 2, :] = zcol


def _conv3x3(pad_ref, col_ref, acc_ref, w_ref, H2, W2, C_in):
    """3x3 SAME conv: dx taps folded into K (partial im2col), 3 bf16 matmuls."""
    # col[h, w, dx*C_in:(dx+1)*C_in] = pad[h, w+dx, :]
    for dx in range(3):
        col_ref[:, :, dx * C_in:(dx + 1) * C_in] = pad_ref[:, dx:dx + W2, :]
    acc_ref[...] = jnp.zeros_like(acc_ref)
    for dy in range(3):
        lhs = col_ref[dy:dy + H2, :, :].reshape(H2 * W2, 3 * C_in)
        acc_ref[...] += jnp.dot(lhs.astype(jnp.bfloat16), w_ref[dy],
                                preferred_element_type=jnp.float32)


def _stats_and_write(acc_ref, y_ref, stats_ref, H2, W2, C_out):
    acc = acc_ref[...]                                        # (H2*W2, C_out) f32
    stats_ref[0, 0:1, :] = jnp.sum(acc, axis=0, keepdims=True)
    stats_ref[0, 1:2, :] = jnp.sum(acc * acc, axis=0, keepdims=True)
    y_ref[...] = acc.reshape(1, H2, W2, C_out)


# ------------------------------- kernels --------------------------------
def pool_conv_kernel(x_ref, w_ref, y_ref, stats_ref, pad_ref, col_ref, acc_ref):
    # x_ref : (4, 1, H2, W2, Cin) f32 -- leading 4 = 2x2 pooling-window offsets
    # w_ref : (3, 3*Cin, Cmid) bf16
    _, _, H2, W2, Cin = x_ref.shape
    C_out = acc_ref.shape[1]
    pooled = jnp.maximum(jnp.maximum(x_ref[0, 0], x_ref[1, 0]),
                         jnp.maximum(x_ref[2, 0], x_ref[3, 0]))  # (H2, W2, Cin)
    _zero_halo(pad_ref, H2, W2, Cin)
    pad_ref[1:H2 + 1, 1:W2 + 1, :] = pooled
    _conv3x3(pad_ref, col_ref, acc_ref, w_ref, H2, W2, Cin)
    _stats_and_write(acc_ref, y_ref, stats_ref, H2, W2, C_out)


def bn_relu_conv_kernel(y_in_ref, scale_ref, shift_ref, w_ref,
                        y_ref, stats_ref, pad_ref, col_ref, acc_ref):
    # y_in_ref : (1, H2, W2, Cmid) f32 (pre-BN conv1 output)
    _, H2, W2, C_in = y_in_ref.shape
    C_out = acc_ref.shape[1]
    h = jnp.maximum(y_in_ref[0] * scale_ref[...] + shift_ref[...], 0.0)
    _zero_halo(pad_ref, H2, W2, C_in)
    pad_ref[1:H2 + 1, 1:W2 + 1, :] = h
    _conv3x3(pad_ref, col_ref, acc_ref, w_ref, H2, W2, C_in)
    _stats_and_write(acc_ref, y_ref, stats_ref, H2, W2, C_out)


def bn_relu_kernel(y_ref, scale_ref, shift_ref, out_ref):
    # y_ref : (1, H2, W2*Cout) lane-dense slab
    out_ref[...] = jnp.maximum(y_ref[...] * scale_ref[...] + shift_ref[...], 0.0)


# ------------------------------- wrapper ---------------------------------
def _bn_scale_shift(stats, gamma, beta, count):
    """Partial (sum, sumsq) per sample -> fused per-channel scale/shift."""
    tot = jnp.sum(stats, axis=0)                   # (2, C)
    mean = tot[0] / count
    var = tot[1] / count - mean * mean             # biased var (BN training mode)
    scale = gamma * jax.lax.rsqrt(var + EPS)
    shift = beta - mean * scale
    return scale.reshape(1, -1), shift.reshape(1, -1)


def down_forward(x_nchw, w1, w2, g1, b1, g2, b2):
    """Down(in_channels, out_channels) forward. x_nchw: (N, Cin, H, W)."""
    N, Cin, H, W = x_nchw.shape
    assert H % 2 == 0 and W % 2 == 0, "MaxPool2d(2) path assumes even H, W"
    H2, W2 = H // 2, W // 2
    Cmid = w1.shape[-1]
    Cout = w2.shape[-1]
    count = float(N * H2 * W2)

    # One layout pass: NCHW -> window-split NHWC (4, N, H2, W2, Cin).
    # The pooling-window split is folded into the single mandatory transpose.
    xw = x_nchw.reshape(N, Cin, H2, 2, W2, 2)
    xw = jnp.transpose(xw, (3, 5, 0, 2, 4, 1)).reshape(4, N, H2, W2, Cin)

    # bf16 MXU operands; dx folded into K -> weights reshaped to (3, 3*C, Cout).
    w1b = w1.astype(jnp.bfloat16).reshape(3, 3 * Cin, Cmid)
    w2b = w2.astype(jnp.bfloat16).reshape(3, 3 * Cmid, Cout)

    cparams = pltpu.CompilerParams(dimension_semantics=("parallel",),
                                   vmem_limit_bytes=_VMEM_LIMIT)

    # ---- stage 1: maxpool(2) + conv1 (+ BN1 partial stats) ----
    y1, stats1 = pl.pallas_call(
        pool_conv_kernel,
        grid=(N,),
        in_specs=[
            pl.BlockSpec((4, 1, H2, W2, Cin), lambda n: (0, n, 0, 0, 0)),
            pl.BlockSpec((3, 3 * Cin, Cmid), lambda n: (0, 0, 0)),
        ],
        out_specs=[
            pl.BlockSpec((1, H2, W2, Cmid), lambda n: (n, 0, 0, 0)),
            pl.BlockSpec((1, 2, Cmid), lambda n: (n, 0, 0)),
        ],
        out_shape=[
            jax.ShapeDtypeStruct((N, H2, W2, Cmid), jnp.float32),
            jax.ShapeDtypeStruct((N, 2, Cmid), jnp.float32),
        ],
        scratch_shapes=[
            pltpu.VMEM((H2 + 2, W2 + 2, Cin), jnp.float32),     # halo pad
            pltpu.VMEM((H2 + 2, W2, 3 * Cin), jnp.float32),     # partial im2col
            pltpu.VMEM((H2 * W2, Cmid), jnp.float32),           # accumulator
        ],
        compiler_params=cparams,
    )(xw, w1b)

    scale1, shift1 = _bn_scale_shift(stats1, g1, b1, count)

    # ---- stage 2: BN1 + ReLU + conv2 (+ BN2 partial stats) ----
    y2, stats2 = pl.pallas_call(
        bn_relu_conv_kernel,
        grid=(N,),
        in_specs=[
            pl.BlockSpec((1, H2, W2, Cmid), lambda n: (n, 0, 0, 0)),
            pl.BlockSpec((1, Cmid), lambda n: (0, 0)),
            pl.BlockSpec((1, Cmid), lambda n: (0, 0)),
            pl.BlockSpec((3, 3 * Cmid, Cout), lambda n: (0, 0, 0)),
        ],
        out_specs=[
            pl.BlockSpec((1, H2, W2, Cout), lambda n: (n, 0, 0, 0)),
            pl.BlockSpec((1, 2, Cout), lambda n: (n, 0, 0)),
        ],
        out_shape=[
            jax.ShapeDtypeStruct((N, H2, W2, Cout), jnp.float32),
            jax.ShapeDtypeStruct((N, 2, Cout), jnp.float32),
        ],
        scratch_shapes=[
            pltpu.VMEM((H2 + 2, W2 + 2, Cmid), jnp.float32),
            pltpu.VMEM((H2 + 2, W2, 3 * Cmid), jnp.float32),
            pltpu.VMEM((H2 * W2, Cout), jnp.float32),
        ],
        compiler_params=cparams,
    )(y1, scale1, shift1, w2b)

    scale2, shift2 = _bn_scale_shift(stats2, g2, b2, count)

    # ---- stage 3: BN2 + ReLU, lane-dense (W2*Cout) output slab ----
    y2_flat = y2.reshape(N, H2, W2 * Cout)          # free row-major reshape
    scale2_t = jnp.tile(scale2, (1, W2))            # (1, W2*Cout)
    shift2_t = jnp.tile(shift2, (1, W2))
    out_flat = pl.pallas_call(
        bn_relu_kernel,
        grid=(N,),
        in_specs=[
            pl.BlockSpec((1, H2, W2 * Cout), lambda n: (n, 0, 0)),
            pl.BlockSpec((1, W2 * Cout), lambda n: (0, 0)),
            pl.BlockSpec((1, W2 * Cout), lambda n: (0, 0)),
        ],
        out_specs=pl.BlockSpec((1, H2, W2 * Cout), lambda n: (n, 0, 0)),
        out_shape=jax.ShapeDtypeStruct((N, H2, W2 * Cout), jnp.float32),
        compiler_params=cparams,
    )(y2_flat, scale2_t, shift2_t)

    out_nhwc = out_flat.reshape(N, H2, W2, Cout)
    return jnp.transpose(out_nhwc, (0, 3, 1, 2))    # back to NCHW


# ---------------------- pure-JAX reference for validation ----------------------
def ref_down(x_nchw, w1, w2, g1, b1, g2, b2):
    N, C, H, W = x_nchw.shape
    xp = x_nchw.reshape(N, C, H // 2, 2, W // 2, 2).max(axis=(3, 5))

    def conv_bn_relu(x, w, g, b):
        y = jax.lax.conv_general_dilated(
            x, w, window_strides=(1, 1), padding="SAME",
            dimension_numbers=("NCHW", "HWIO", "NCHW"),
            precision=jax.lax.Precision.HIGHEST)
        mean = y.mean(axis=(0, 2, 3), keepdims=True)
        var = ((y - mean) ** 2).mean(axis=(0, 2, 3), keepdims=True)
        yn = (y - mean) * jax.lax.rsqrt(var + EPS)
        yn = yn * g.reshape(1, -1, 1, 1) + b.reshape(1, -1, 1, 1)
        return jnp.maximum(yn, 0.0)

    h = conv_bn_relu(xp, w1, g1, b1)
    return conv_bn_relu(h, w2, g2, b2)


if __name__ == "__main__":
    N, Cin, Cout, H, W = 2, 4, 8, 16, 16
    Cmid = Cout  # DoubleConv default: mid_channels = out_channels

    key = jax.random.PRNGKey(0)
    k1, k2, k3, k4, k5, k6, k7 = jax.random.split(key, 7)
    x = jax.random.normal(k1, (N, Cin, H, W), jnp.float32)
    # Deterministic synthetic parameters (shapes match the PyTorch module).
    # Weights are bf16-representable (the kernel feeds the MXU bf16 operands).
    w1 = (0.2 * jax.random.normal(k2, (3, 3, Cin, Cmid), jnp.float32)
          ).astype(jnp.bfloat16).astype(jnp.float32)                   # HWIO
    w2 = (0.2 * jax.random.normal(k3, (3, 3, Cmid, Cout), jnp.float32)
          ).astype(jnp.bfloat16).astype(jnp.float32)                   # HWIO
    g1 = 1.0 + 0.1 * jax.random.normal(k4, (Cmid,), jnp.float32)
    b1 = 0.1 * jax.random.normal(k5, (Cmid,), jnp.float32)
    g2 = 1.0 + 0.1 * jax.random.normal(k6, (Cout,), jnp.float32)
    b2 = 0.1 * jax.random.normal(k7, (Cout,), jnp.float32)

    out = down_forward(x, w1, w2, g1, b1, g2, b2)
    out = jax.block_until_ready(out)

    ref = ref_down(x, w1, w2, g1, b1, g2, b2)
    assert out.shape == (N, Cout, H // 2, W // 2), out.shape
    max_err = jnp.max(jnp.abs(out - ref))
    # Tolerance accounts for bf16 MXU operands vs the f32 HIGHEST reference.
    if not jnp.allclose(out, ref, atol=1e-1, rtol=1e-1):
        raise AssertionError(f"mismatch vs reference, max_err={max_err}")
    print("KERNEL_OK")
</pallas_src>

<mosaic_0001>
module attributes {stable_mosaic.version = 11 : i64} {
  func.func @pool_conv_kernel(%arg0: i32, %arg1: memref<4x1x8x8x4xf32, #tpu.memory_space<vmem>>, %arg2: memref<3x12x8xbf16, #tpu.memory_space<vmem>>, %arg3: memref<1x8x8x8xf32, #tpu.memory_space<vmem>>, %arg4: memref<1x2x8xf32, #tpu.memory_space<vmem>>, %arg5: memref<10x10x4xf32, #tpu.memory_space<vmem>>, %arg6: memref<10x8x12xf32, #tpu.memory_space<vmem>>, %arg7: memref<64x8xf32, #tpu.memory_space<vmem>>) attributes {dimension_semantics = [#tpu.dimension_semantics<parallel>], iteration_bounds = array<i64: 2>, scalar_prefetch = 0 : i64, scratch_operands = 3 : i64, tpu.core_type = #tpu.core_type<tc>, window_params = [{transform_indices = @transform_0, window_bounds = array<i64: 4, 1, 8, 8, 4>}, {pipeline_mode = #tpu.pipeline_mode<synchronous>, transform_indices = @transform_1, window_bounds = array<i64: 3, 12, 8>}, {transform_indices = @transform_2, window_bounds = array<i64: 1, 8, 8, 8>}, {transform_indices = @transform_3, window_bounds = array<i64: 1, 2, 8>}]} {
    %c0 = arith.constant 0 : index
    %c0_0 = arith.constant 0 : index
    %c0_1 = arith.constant 0 : index
    %c0_2 = arith.constant 0 : index
    %c0_3 = arith.constant 0 : index
    %0 = vector.load %arg1[%c0, %c0_0, %c0_1, %c0_2, %c0_3] : memref<4x1x8x8x4xf32, #tpu.memory_space<vmem>>, vector<1x1x8x8x4xf32>
    %1 = vector.shape_cast %0 : vector<1x1x8x8x4xf32> to vector<8x8x4xf32>
    %c1 = arith.constant 1 : index
    %c0_4 = arith.constant 0 : index
    %c0_5 = arith.constant 0 : index
    %c0_6 = arith.constant 0 : index
    %c0_7 = arith.constant 0 : index
    %2 = vector.load %arg1[%c1, %c0_4, %c0_5, %c0_6, %c0_7] : memref<4x1x8x8x4xf32, #tpu.memory_space<vmem>>, vector<1x1x8x8x4xf32>
    %3 = vector.shape_cast %2 : vector<1x1x8x8x4xf32> to vector<8x8x4xf32>
    %4 = arith.maximumf %1, %3 : vector<8x8x4xf32>
    %c2 = arith.constant 2 : index
    %c0_8 = arith.constant 0 : index
    %c0_9 = arith.constant 0 : index
    %c0_10 = arith.constant 0 : index
    %c0_11 = arith.constant 0 : index
    %5 = vector.load %arg1[%c2, %c0_8, %c0_9, %c0_10, %c0_11] : memref<4x1x8x8x4xf32, #tpu.memory_space<vmem>>, vector<1x1x8x8x4xf32>
    %6 = vector.shape_cast %5 : vector<1x1x8x8x4xf32> to vector<8x8x4xf32>
    %c3 = arith.constant 3 : index
    %c0_12 = arith.constant 0 : index
    %c0_13 = arith.constant 0 : index
    %c0_14 = arith.constant 0 : index
    %c0_15 = arith.constant 0 : index
    %7 = vector.load %arg1[%c3, %c0_12, %c0_13, %c0_14, %c0_15] : memref<4x1x8x8x4xf32, #tpu.memory_space<vmem>>, vector<1x1x8x8x4xf32>
    %8 = vector.shape_cast %7 : vector<1x1x8x8x4xf32> to vector<8x8x4xf32>
    %9 = arith.maximumf %6, %8 : vector<8x8x4xf32>
    %10 = arith.maximumf %4, %9 : vector<8x8x4xf32>
    %cst = arith.constant 0.000000e+00 : f32
    %11 = vector.broadcast %cst : f32 to vector<1x10x4xf32>
    %c0_16 = arith.constant 0 : index
    %c0_17 = arith.constant 0 : index
    %c0_18 = arith.constant 0 : index
    %12 = vector.load %arg5[%c0_16, %c0_17, %c0_18] : memref<10x10x4xf32, #tpu.memory_space<vmem>>, vector<1x10x4xf32>
    tpu.vector_store %arg5[%c0_16, %c0_17, %c0_18], %11 {strides = array<i32>} : memref<10x10x4xf32, #tpu.memory_space<vmem>>, vector<1x10x4xf32>,
    %c9 = arith.constant 9 : index
    %c0_19 = arith.constant 0 : index
    %c0_20 = arith.constant 0 : index
    %13 = vector.load %arg5[%c9, %c0_19, %c0_20] : memref<10x10x4xf32, #tpu.memory_space<vmem>>, vector<1x10x4xf32>
    tpu.vector_store %arg5[%c9, %c0_19, %c0_20], %11 {strides = array<i32>} : memref<10x10x4xf32, #tpu.memory_space<vmem>>, vector<1x10x4xf32>,
    %cst_21 = arith.constant 0.000000e+00 : f32
    %14 = vector.broadcast %cst_21 : f32 to vector<10x1x4xf32>
    %c0_22 = arith.constant 0 : index
    %c0_23 = arith.constant 0 : index
    %c0_24 = arith.constant 0 : index
    %15 = vector.load %arg5[%c0_22, %c0_23, %c0_24] : memref<10x10x4xf32, #tpu.memory_space<vmem>>, vector<10x1x4xf32>
    tpu.vector_store %arg5[%c0_22, %c0_23, %c0_24], %14 {strides = array<i32>} : memref<10x10x4xf32, #tpu.memory_space<vmem>>, vector<10x1x4xf32>,
    %c0_25 = arith.constant 0 : index
    %c9_26 = arith.constant 9 : index
    %c0_27 = arith.constant 0 : index
    %16 = vector.load %arg5[%c0_25, %c9_26, %c0_27] : memref<10x10x4xf32, #tpu.memory_space<vmem>>, vector<10x1x4xf32>
    tpu.vector_store %arg5[%c0_25, %c9_26, %c0_27], %14 {strides = array<i32>} : memref<10x10x4xf32, #tpu.memory_space<vmem>>, vector<10x1x4xf32>,
    %c1_28 = arith.constant 1 : index
    %c1_29 = arith.constant 1 : index
    %c0_30 = arith.constant 0 : index
    %17 = vector.load %arg5[%c1_28, %c1_29, %c0_30] : memref<10x10x4xf32, #tpu.memory_space<vmem>>, vector<8x8x4xf32>
    tpu.vector_store %arg5[%c1_28, %c1_29, %c0_30], %10 {strides = array<i32>} : memref<10x10x4xf32, #tpu.memory_space<vmem>>, vector<8x8x4xf32>,
    %c0_31 = arith.constant 0 : index
    %c0_32 = arith.constant 0 : index
    %c0_33 = arith.constant 0 : index
    %18 = vector.load %arg5[%c0_31, %c0_32, %c0_33] : memref<10x10x4xf32, #tpu.memory_space<vmem>>, vector<10x8x4xf32>
    %c0_34 = arith.constant 0 : index
    %c0_35 = arith.constant 0 : index
    %c0_36 = arith.constant 0 : index
    %19 = vector.load %arg6[%c0_34, %c0_35, %c0_36] : memref<10x8x12xf32, #tpu.memory_space<vmem>>, vector<10x8x4xf32>
    tpu.vector_store %arg6[%c0_34, %c0_35, %c0_36], %18 {strides = array<i32>} : memref<10x8x12xf32, #tpu.memory_space<vmem>>, vector<10x8x4xf32>,
    %c0_37 = arith.constant 0 : index
    %c1_38 = arith.constant 1 : index
    %c0_39 = arith.constant 0 : index
    %20 = vector.load %arg5[%c0_37, %c1_38, %c0_39] : memref<10x10x4xf32, #tpu.memory_space<vmem>>, vector<10x8x4xf32>
    %c0_40 = arith.constant 0 : index
    %c0_41 = arith.constant 0 : index
    %c4 = arith.constant 4 : index
    %21 = vector.load %arg6[%c0_40, %c0_41, %c4] : memref<10x8x12xf32, #tpu.memory_space<vmem>>, vector<10x8x4xf32>
    tpu.vector_store %arg6[%c0_40, %c0_41, %c4], %20 {strides = array<i32>} : memref<10x8x12xf32, #tpu.memory_space<vmem>>, vector<10x8x4xf32>,
    %c0_42 = arith.constant 0 : index
    %c2_43 = arith.constant 2 : index
    %c0_44 = arith.constant 0 : index
    %22 = vector.load %arg5[%c0_42, %c2_43, %c0_44] : memref<10x10x4xf32, #tpu.memory_space<vmem>>, vector<10x8x4xf32>
    %c0_45 = arith.constant 0 : index
    %c0_46 = arith.constant 0 : index
    %c8 = arith.constant 8 : index
    %23 = vector.load %arg6[%c0_45, %c0_46, %c8] : memref<10x8x12xf32, #tpu.memory_space<vmem>>, vector<10x8x4xf32>
    tpu.vector_store %arg6[%c0_45, %c0_46, %c8], %22 {strides = array<i32>} : memref<10x8x12xf32, #tpu.memory_space<vmem>>, vector<10x8x4xf32>,
    %cst_47 = arith.constant 0.000000e+00 : f32
    %24 = vector.broadcast %cst_47 : f32 to vector<64x8xf32>
    %c0_48 = arith.constant 0 : index
    %c0_49 = arith.constant 0 : index
    %25 = vector.load %arg7[%c0_48, %c0_49] : memref<64x8xf32, #tpu.memory_space<vmem>>, vector<64x8xf32>
    tpu.vector_store %arg7[%c0_48, %c0_49], %24 {strides = array<i32>} : memref<64x8xf32, #tpu.memory_space<vmem>>, vector<64x8xf32>,
    %c0_50 = arith.constant 0 : index
    %c0_51 = arith.constant 0 : index
    %c0_52 = arith.constant 0 : index
    %26 = vector.load %arg6[%c0_50, %c0_51, %c0_52] : memref<10x8x12xf32, #tpu.memory_space<vmem>>, vector<8x8x12xf32>
    %27 = vector.shape_cast %26 : vector<8x8x12xf32> to vector<64x12xf32>
    %c0_53 = arith.constant 0 : index
    %c0_54 = arith.constant 0 : index
    %28 = vector.load %arg7[%c0_53, %c0_54] : memref<64x8xf32, #tpu.memory_space<vmem>>, vector<64x8xf32>
    %29 = arith.truncf %27 : vector<64x12xf32> to vector<64x12xbf16>
    %c0_55 = arith.constant 0 : index
    %c0_56 = arith.constant 0 : index
    %c0_57 = arith.constant 0 : index
    %30 = vector.load %arg2[%c0_55, %c0_56, %c0_57] : memref<3x12x8xbf16, #tpu.memory_space<vmem>>, vector<1x12x8xbf16>
    %31 = vector.shape_cast %30 : vector<1x12x8xbf16> to vector<12x8xbf16>
    %cst_58 = arith.constant dense<0.000000e+00> : vector<64x8xf32>
    %32 = tpu.matmul %29, %31, %cst_58 {dimension_numbers = #tpu.dot_dimension_numbers<[1], [0], [0], [1], [0, 0, 1, 1], [], []>} : vector<64x12xbf16>, vector<12x8xbf16>, vector<64x8xf32> -> vector<64x8xf32>
    %33 = arith.addf %28, %32 : vector<64x8xf32>
    %c0_59 = arith.constant 0 : index
    %c0_60 = arith.constant 0 : index
    %34 = vector.load %arg7[%c0_59, %c0_60] : memref<64x8xf32, #tpu.memory_space<vmem>>, vector<64x8xf32>
    tpu.vector_store %arg7[%c0_59, %c0_60], %33 {strides = array<i32>} : memref<64x8xf32, #tpu.memory_space<vmem>>, vector<64x8xf32>,
    %c1_61 = arith.constant 1 : index
    %c0_62 = arith.constant 0 : index
    %c0_63 = arith.constant 0 : index
    %35 = vector.load %arg6[%c1_61, %c0_62, %c0_63] : memref<10x8x12xf32, #tpu.memory_space<vmem>>, vector<8x8x12xf32>
    %36 = vector.shape_cast %35 : vector<8x8x12xf32> to vector<64x12xf32>
    %c0_64 = arith.constant 0 : index
    %c0_65 = arith.constant 0 : index
    %37 = vector.load %arg7[%c0_64, %c0_65] : memref<64x8xf32, #tpu.memory_space<vmem>>, vector<64x8xf32>
    %38 = arith.truncf %36 : vector<64x12xf32> to vector<64x12xbf16>
    %c1_66 = arith.constant 1 : index
    %c0_67 = arith.constant 0 : index
    %c0_68 = arith.constant 0 : index
    %39 = vector.load %arg2[%c1_66, %c0_67, %c0_68] : memref<3x12x8xbf16, #tpu.memory_space<vmem>>, vector<1x12x8xbf16>
    %40 = vector.shape_cast %39 : vector<1x12x8xbf16> to vector<12x8xbf16>
    %cst_69 = arith.constant dense<0.000000e+00> : vector<64x8xf32>
    %41 = tpu.matmul %38, %40, %cst_69 {dimension_numbers = #tpu.dot_dimension_numbers<[1], [0], [0], [1], [0, 0, 1, 1], [], []>} : vector<64x12xbf16>, vector<12x8xbf16>, vector<64x8xf32> -> vector<64x8xf32>
    %42 = arith.addf %37, %41 : vector<64x8xf32>
    %c0_70 = arith.constant 0 : index
    %c0_71 = arith.constant 0 : index
    %43 = vector.load %arg7[%c0_70, %c0_71] : memref<64x8xf32, #tpu.memory_space<vmem>>, vector<64x8xf32>
    tpu.vector_store %arg7[%c0_70, %c0_71], %42 {strides = array<i32>} : memref<64x8xf32, #tpu.memory_space<vmem>>, vector<64x8xf32>,
    %c2_72 = arith.constant 2 : index
    %c0_73 = arith.constant 0 : index
    %c0_74 = arith.constant 0 : index
    %44 = vector.load %arg6[%c2_72, %c0_73, %c0_74] : memref<10x8x12xf32, #tpu.memory_space<vmem>>, vector<8x8x12xf32>
    %45 = vector.shape_cast %44 : vector<8x8x12xf32> to vector<64x12xf32>
    %c0_75 = arith.constant 0 : index
    %c0_76 = arith.constant 0 : index
    %46 = vector.load %arg7[%c0_75, %c0_76] : memref<64x8xf32, #tpu.memory_space<vmem>>, vector<64x8xf32>
    %47 = arith.truncf %45 : vector<64x12xf32> to vector<64x12xbf16>
    %c2_77 = arith.constant 2 : index
    %c0_78 = arith.constant 0 : index
    %c0_79 = arith.constant 0 : index
    %48 = vector.load %arg2[%c2_77, %c0_78, %c0_79] : memref<3x12x8xbf16, #tpu.memory_space<vmem>>, vector<1x12x8xbf16>
    %49 = vector.shape_cast %48 : vector<1x12x8xbf16> to vector<12x8xbf16>
    %cst_80 = arith.constant dense<0.000000e+00> : vector<64x8xf32>
    %50 = tpu.matmul %47, %49, %cst_80 {dimension_numbers = #tpu.dot_dimension_numbers<[1], [0], [0], [1], [0, 0, 1, 1], [], []>} : vector<64x12xbf16>, vector<12x8xbf16>, vector<64x8xf32> -> vector<64x8xf32>
    %51 = arith.addf %46, %50 : vector<64x8xf32>
    %c0_81 = arith.constant 0 : index
    %c0_82 = arith.constant 0 : index
    %52 = vector.load %arg7[%c0_81, %c0_82] : memref<64x8xf32, #tpu.memory_space<vmem>>, vector<64x8xf32>
    tpu.vector_store %arg7[%c0_81, %c0_82], %51 {strides = array<i32>} : memref<64x8xf32, #tpu.memory_space<vmem>>, vector<64x8xf32>,
    %c0_83 = arith.constant 0 : index
    %c0_84 = arith.constant 0 : index
    %53 = vector.load %arg7[%c0_83, %c0_84] : memref<64x8xf32, #tpu.memory_space<vmem>>, vector<64x8xf32>
    %cst_85 = arith.constant dense<0.000000e+00> : vector<8xf32>
    %54 = vector.multi_reduction <add>, %53, %cst_85 [0] : vector<64x8xf32> to vector<8xf32>
    %55 = vector.shape_cast %54 : vector<8xf32> to vector<1x8xf32>
    %c0_86 = arith.constant 0 : index
    %c0_87 = arith.constant 0 : index
    %c0_88 = arith.constant 0 : index
    %56 = vector.load %arg4[%c0_86, %c0_87, %c0_88] : memref<1x2x8xf32, #tpu.memory_space<vmem>>, vector<1x1x8xf32>
    %57 = vector.shape_cast %56 : vector<1x1x8xf32> to vector<1x8xf32>
    %58 = vector.shape_cast %55 : vector<1x8xf32> to vector<1x1x8xf32>
    tpu.vector_store %arg4[%c0_86, %c0_87, %c0_88], %58 {strides = array<i32>} : memref<1x2x8xf32, #tpu.memory_space<vmem>>, vector<1x1x8xf32>,
    %59 = arith.mulf %53, %53 : vector<64x8xf32>
    %cst_89 = arith.constant dense<0.000000e+00> : vector<8xf32>
    %60 = vector.multi_reduction <add>, %59, %cst_89 [0] : vector<64x8xf32> to vector<8xf32>
    %61 = vector.shape_cast %60 : vector<8xf32> to vector<1x8xf32>
    %c0_90 = arith.constant 0 : index
    %c1_91 = arith.constant 1 : index
    %c0_92 = arith.constant 0 : index
    %62 = vector.load %arg4[%c0_90, %c1_91, %c0_92] : memref<1x2x8xf32, #tpu.memory_space<vmem>>, vector<1x1x8xf32>
    %63 = vector.shape_cast %62 : vector<1x1x8xf32> to vector<1x8xf32>
    %64 = vector.shape_cast %61 : vector<1x8xf32> to vector<1x1x8xf32>
    tpu.vector_store %arg4[%c0_90, %c1_91, %c0_92], %64 {strides = array<i32>} : memref<1x2x8xf32, #tpu.memory_space<vmem>>, vector<1x1x8xf32>,
    %65 = vector.shape_cast %53 : vector<64x8xf32> to vector<1x8x8x8xf32>
    %c0_93 = arith.constant 0 : index
    %c0_94 = arith.constant 0 : index
    %c0_95 = arith.constant 0 : index
    %c0_96 = arith.constant 0 : index
    %66 = vector.load %arg3[%c0_93, %c0_94, %c0_95, %c0_96] : memref<1x8x8x8xf32, #tpu.memory_space<vmem>>, vector<1x8x8x8xf32>
    tpu.vector_store %arg3[%c0_93, %c0_94, %c0_95, %c0_96], %65 {strides = array<i32>} : memref<1x8x8x8xf32, #tpu.memory_space<vmem>>, vector<1x8x8x8xf32>,
    return
  }
  func.func @transform_0(%arg0: i32) -> (i32, i32, i32, i32, i32) {
    %c0_i32 = arith.constant 0 : i32
    %c0_i32_0 = arith.constant 0 : i32
    %c0_i32_1 = arith.constant 0 : i32
    %c0_i32_2 = arith.constant 0 : i32
    %c0_i32_3 = arith.constant 0 : i32
    return %c0_i32, %arg0, %c0_i32_0, %c0_i32_1, %c0_i32_2 : i32, i32, i32, i32, i32
  }
  func.func @transform_1(%arg0: i32) -> (i32, i32, i32) {
    %c0_i32 = arith.constant 0 : i32
    %c0_i32_0 = arith.constant 0 : i32
    %c0_i32_1 = arith.constant 0 : i32
    %c0_i32_2 = arith.constant 0 : i32
    return %c0_i32, %c0_i32_0, %c0_i32_1 : i32, i32, i32
  }
  func.func @transform_2(%arg0: i32) -> (i32, i32, i32, i32) {
    %c0_i32 = arith.constant 0 : i32
    %c0_i32_0 = arith.constant 0 : i32
    %c0_i32_1 = arith.constant 0 : i32
    %c0_i32_2 = arith.constant 0 : i32
    return %arg0, %c0_i32, %c0_i32_0, %c0_i32_1 : i32, i32, i32, i32
  }
  func.func @transform_3(%arg0: i32) -> (i32, i32, i32) {
    %c0_i32 = arith.constant 0 : i32
    %c0_i32_0 = arith.constant 0 : i32
    %c0_i32_1 = arith.constant 0 : i32
    return %arg0, %c0_i32, %c0_i32_0 : i32, i32, i32
  }
}

</mosaic_0001>

<bundles_post_ra>
// kernel: tpu_custom_call.1
= control target key start
LH: loop header
LB: loop body
LE: loop exit
PB: predicated region body
PF: predicated region fallthrough
CT: control target
= control target key end

     0   :  { %9 = vsyncpa [#allocation7], 0  ;;  %s1908_s0 = inlined_call_operand.vmem [shape: f32[4,2,8,8,4], index: 0, kind: input, shape index: {}]   ;;  %s1909_s1 = inlined_call_operand.vmem [shape: bf16[3,12,8], index: 1, kind: input, shape index: {}]   ;;  %s1910_s2 = inlined_call_operand.hbm [shape: f32[2,8,8,8], index: 2, kind: output, shape index: {0}]   ;;  %s1911_s3 = inlined_call_operand.hbm [shape: f32[2,2,8], index: 3, kind: output, shape index: {1}]  }
   0x1   :  { %11 = vsyncpa [#allocation7 + $0x1], 0 }
   0x2   :  { %12 = vsyncpa [#allocation9], 0 }
   0x3   :  { %14 = vsyncpa [#allocation9 + $0x1], 0  ;;  %s1449_s12 = smov 0   ;;  %s1451_s13 = smov 0  }
   0x4   :  { %s1453_s14 = smov 0   ;;  %s1455_s15 = smov 0  }
   0x5 LB: > { %s1470_s16 = sadd.s32 4294967295, %s1421_s15   ;;  %s1163_s17 = sadd.s32 4294967294, %s1421_s15   ;;  %s1421_s15 = sphi %s1455_s15, %s1917_s15   ;;  %s1417_s14 = sphi %s1453_s14, %s1916_s14   ;;  %s1413_s13 = sphi %s1451_s13, %s1915_s13   ;;  %s1409_s12 = sphi %s1449_s12, %s1914_s12  }
   0x6   : > { %s1474_s18 = sadd.s32 1, %s1421_s15   ;;  %s27_s19 = sadd.s32 1, %s1417_s14 }
   0x7   : > { %s24_s20 = ssub.s32 %s1421_s15, %s1474_s18  ;;  %p34_p0 = scmp.ne.s32.totalorder %s1417_s14, %s1413_s13 }
   0x8   : > { %p25_p1 = scmp.eq.s32.totalorder %s24_s20, 0  ;;  %p35_p2 = scmp.eq.s32.totalorder %s1421_s15, 0 }
   0x9   : > { %p85_p3 = scmp.eq.s32.totalorder %s1470_s16, 1  ;;  %p90_p4 = scmp.ne.s32.totalorder %s1413_s13, %s1409_s12 }
   0xa   : > { %s1486_s21 = scalar_select %p25_p1, %s1417_s14, %s27_s19  }
   0xb   : > { %p36_p5 = por %p35_p2, %p34_p0  ;;  %p1488_p6 = por %p85_p3, %p34_p0 }
   0xc   : > { %p91_p7 = scmp.eq.s32.totalorder %s1163_s17, 1  ;;  %p1165_p9 = scmp.ge.s32.totalorder %s1421_s15, 2 }
   0xe   : > { %p1492_p8 = por %p91_p7, %p90_p4  ;;  %136 = sbr.rel (%p1165_p9) target bundleno = 41 (0x29), region = 20 }
  0x15   : > { %139 = sbr.rel (!%p36_p5) target bundleno = 41 (0x29), region = 24  ;;  %s141_s24 = sand.u32 (%p36_p5), 1, %s1417_s14  }
  0x16   : > { %s1223_s25 = sshll.u32 (%p36_p5), %s1421_s15, 6  ;;  %s1166_s26 = sshll.u32 (%p36_p5), %s141_s24, 8 }
  0x17   : > { %s1504_s29 = scalar_lea.vmem (%p36_p5), %s1908_s0, %s1223_s25  ;;  %s1509_s30 = scalar_lea.vmem (%p36_p5), [#allocation5], %s1166_s26 }
  0x18   : > { %v236_v0 = vld [vmem:[%s1504_s29] sm:$0xff] (%p36_p5)  ;;  %v238_v1 = vld [vmem:[%s1504_s29 + $0x8] sm:$0xff] (%p36_p5)  ;;  %v240_v2 = vld [vmem:[%s1504_s29 + $0x10] sm:$0xff] (%p36_p5) }
  0x19   : > { %237 = vst [vmem:[%s1509_s30] sm:$0xff] (%p36_p5), %v236_v0  ;;  %239 = vst [vmem:[%s1509_s30 + $0x8] sm:$0xff] (%p36_p5), %v238_v1  ;;  %v242_v3 = vld [vmem:[%s1504_s29 + $0x18] sm:$0xff] (%p36_p5)  ;;  %v244_v4 = vld [vmem:[%s1504_s29 + $0x20] sm:$0xff] (%p36_p5) }
  0x1a   : > { %241 = vst [vmem:[%s1509_s30 + $0x10] sm:$0xff] (%p36_p5), %v240_v2  ;;  %v246_v5 = vld [vmem:[%s1504_s29 + $0x28] sm:$0xff] (%p36_p5)  ;;  %243 = vst [vmem:[%s1509_s30 + $0x18] sm:$0xff] (%p36_p5), %v242_v3  ;;  %v248_v6 = vld [vmem:[%s1504_s29 + $0x30] sm:$0xff] (%p36_p5) }
  0x1b   : > { %245 = vst [vmem:[%s1509_s30 + $0x20] sm:$0xff] (%p36_p5), %v244_v4  ;;  %247 = vst [vmem:[%s1509_s30 + $0x28] sm:$0xff] (%p36_p5), %v246_v5  ;;  %v250_v7 = vld [vmem:[%s1504_s29 + $0x38] sm:$0xff] (%p36_p5)  ;;  %v252_v8 = vld [vmem:[%s1504_s29 + $0x80] sm:$0xff] (%p36_p5) }
  0x1c   : > { %249 = vst [vmem:[%s1509_s30 + $0x30] sm:$0xff] %v248_v6  ;;  %251 = vst [vmem:[%s1509_s30 + $0x38] sm:$0xff] %v250_v7  ;;  %v254_v9 = vld [vmem:[%s1504_s29 + $0x88] sm:$0xff]  ;;  %v256_v10 = vld [vmem:[%s1504_s29 + $0x90] sm:$0xff] }
  0x1d   : > { %253 = vst [vmem:[%s1509_s30 + $0x40] sm:$0xff] %v252_v8  ;;  %v258_v11 = vld [vmem:[%s1504_s29 + $0x98] sm:$0xff]  ;;  %255 = vst [vmem:[%s1509_s30 + $0x48] sm:$0xff] %v254_v9  ;;  %v260_v12 = vld [vmem:[%s1504_s29 + $0xa0] sm:$0xff] }
  0x1e   : > { %257 = vst [vmem:[%s1509_s30 + $0x50] sm:$0xff] %v256_v10  ;;  %259 = vst [vmem:[%s1509_s30 + $0x58] sm:$0xff] %v258_v11  ;;  %v262_v13 = vld [vmem:[%s1504_s29 + $0xa8] sm:$0xff]  ;;  %v264_v14 = vld [vmem:[%s1504_s29 + $0xb0] sm:$0xff] }
  0x1f   : > { %261 = vst [vmem:[%s1509_s30 + $0x60] sm:$0xff] %v260_v12  ;;  %263 = vst [vmem:[%s1509_s30 + $0x68] sm:$0xff] %v262_v13  ;;  %v266_v15 = vld [vmem:[%s1504_s29 + $0xb8] sm:$0xff]  ;;  %v268_v16 = vld [vmem:[%s1504_s29 + $0x100] sm:$0xff] }
  0x20   : > { %265 = vst [vmem:[%s1509_s30 + $0x70] sm:$0xff] %v264_v14  ;;  %v270_v17 = vld [vmem:[%s1504_s29 + $0x108] sm:$0xff]  ;;  %267 = vst [vmem:[%s1509_s30 + $0x78] sm:$0xff] %v266_v15  ;;  %v272_v18 = vld [vmem:[%s1504_s29 + $0x110] sm:$0xff] }
  0x21   : > { %269 = vst [vmem:[%s1509_s30 + $0x80] sm:$0xff] %v268_v16  ;;  %271 = vst [vmem:[%s1509_s30 + $0x88] sm:$0xff] %v270_v17  ;;  %v274_v19 = vld [vmem:[%s1504_s29 + $0x118] sm:$0xff]  ;;  %v276_v20 = vld [vmem:[%s1504_s29 + $0x120] sm:$0xff] }
  0x22   : > { %273 = vst [vmem:[%s1509_s30 + $0x90] sm:$0xff] %v272_v18  ;;  %275 = vst [vmem:[%s1509_s30 + $0x98] sm:$0xff] %v274_v19  ;;  %v278_v21 = vld [vmem:[%s1504_s29 + $0x128] sm:$0xff]  ;;  %v280_v22 = vld [vmem:[%s1504_s29 + $0x130] sm:$0xff] }
  0x23   : > { %277 = vst [vmem:[%s1509_s30 + $0xa0] sm:$0xff] %v276_v20  ;;  %v282_v23 = vld [vmem:[%s1504_s29 + $0x138] sm:$0xff]  ;;  %279 = vst [vmem:[%s1509_s30 + $0xa8] sm:$0xff] %v278_v21  ;;  %v284_v24 = vld [vmem:[%s1504_s29 + $0x180] sm:$0xff] }
  0x24   : > { %281 = vst [vmem:[%s1509_s30 + $0xb0] sm:$0xff] %v280_v22  ;;  %283 = vst [vmem:[%s1509_s30 + $0xb8] sm:$0xff] %v282_v23  ;;  %v286_v25 = vld [vmem:[%s1504_s29 + $0x188] sm:$0xff]  ;;  %v288_v26 = vld [vmem:[%s1504_s29 + $0x190] sm:$0xff] }
  0x25   : > { %285 = vst [vmem:[%s1509_s30 + $0xc0] sm:$0xff] %v284_v24  ;;  %287 = vst [vmem:[%s1509_s30 + $0xc8] sm:$0xff] %v286_v25  ;;  %v290_v27 = vld [vmem:[%s1504_s29 + $0x198] sm:$0xff]  ;;  %v292_v28 = vld [vmem:[%s1504_s29 + $0x1a0] sm:$0xff] }
  0x26   : > { %289 = vst [vmem:[%s1509_s30 + $0xd0] sm:$0xff] %v288_v26  ;;  %v294_v29 = vld [vmem:[%s1504_s29 + $0x1a8] sm:$0xff]  ;;  %291 = vst [vmem:[%s1509_s30 + $0xd8] sm:$0xff] %v290_v27  ;;  %v296_v30 = vld [vmem:[%s1504_s29 + $0x1b0] sm:$0xff] }
  0x27   : > { %293 = vst [vmem:[%s1509_s30 + $0xe0] sm:$0xff] %v292_v28  ;;  %295 = vst [vmem:[%s1509_s30 + $0xe8] sm:$0xff] %v294_v29  ;;  %v298_v31 = vld [vmem:[%s1504_s29 + $0x1b8] sm:$0xff] }
  0x28   : > { %297 = vst [vmem:[%s1509_s30 + $0xf0] sm:$0xff] %v296_v30  ;;  %299 = vst [vmem:[%s1509_s30 + $0xf8] sm:$0xff] %v298_v31 }
  0x29 PF: > { %p1169_p10 = scmp.ge.s32.totalorder %s1421_s15, 1  ;;  %p304_p11 = scmp.lt.s32.totalorder %s1421_s15, 3 }
  0x2b   : > { %p305_p12 = pnand %p1169_p10, %p304_p11 }
  0x2c   : > { %vm399_vm0 = vcmask (!%p305_p12), 31744   ;;  %vm401_vm1 = vcmask (!%p305_p12), 25600   ;;  %vm406_vm2 = vcmask (!%p305_p12), 24576   ;;  %v1423_v32 = vmov (!%p305_p12), 0.0   ;;  %s1613_s4 = sand.u32 (!%p305_p12), 1, %s1413_s13   ;;  %s1424_s7 = smov (!%p305_p12), 4  }
  0x2d   : > { %308 = sbr.rel (%p305_p12) target bundleno = 517 (0x205), region = 62  ;;  %400 = vst.msk [vmem:[#allocation2] sm:$0xff] (!%p305_p12), %vm399_vm0, %v1423_v32  ;;  %404 = vst.msk [vmem:[#allocation2 + $0x90] sm:$0xff] (!%p305_p12), %vm399_vm0, %v1423_v32  ;;  %s1170_s5 = sshll.u32 (!%p305_p12), %s1613_s4, 8  ;;  %vm627_vm3 = vcmask (!%p305_p12), 1045504   ;;  %vm578_vm4 = vcmask (!%p305_p12), 64512  }
  0x2e   : > { %402 = vst.msk [vmem:[#allocation2 + $0x8] sm:$0x3] (!%p305_p12), %vm401_vm1, %v1423_v32  ;;  %405 = vst.msk [vmem:[#allocation2 + $0x98] sm:$0x3] (!%p305_p12), %vm401_vm1, %v1423_v32  ;;  %s1624_s6 = scalar_lea.vmem (!%p305_p12), [#allocation5], %s1170_s5  ;;  %s1425_s8 = smov (!%p305_p12), 8  }
  0x2f   : > { %408 = vst.msk [vmem:[#allocation2 + $0x10] sm:$0x1] (!%p305_p12), %vm406_vm2, %v1423_v32  ;;  %409 = vst.msk [vmem:[#allocation2 + $0x20] sm:$0x1] (!%p305_p12), %vm406_vm2, %v1423_v32  ;;  %v341_v33 = vld [vmem:[%s1624_s6 + $0x8] sm:$0xff] (!%p305_p12)  ;;  %v340_v38 = vld [vmem:[%s1624_s6] sm:$0xff] (!%p305_p12) }
  0x30   : > { %410 = vst.msk [vmem:[#allocation2 + $0x30] sm:$0x1] (!%p305_p12), %vm406_vm2, %v1423_v32  ;;  %411 = vst.msk [vmem:[#allocation2 + $0x40] sm:$0x1] (!%p305_p12), %vm406_vm2, %v1423_v32  ;;  %v1174_v34 = vld [vmem:[%s1624_s6 + $0x48] sm:$0xff] (!%p305_p12)  ;;  %v1173_v39 = vld [vmem:[%s1624_s6 + $0x40] sm:$0xff] (!%p305_p12) }
  0x31   : > { %412 = vst.msk [vmem:[#allocation2 + $0x50] sm:$0x1] (!%p305_p12), %vm406_vm2, %v1423_v32  ;;  %413 = vst.msk [vmem:[#allocation2 + $0x60] sm:$0x1] (!%p305_p12), %vm406_vm2, %v1423_v32  ;;  %v1182_v35 = vld [vmem:[%s1624_s6 + $0x88] sm:$0xff] (!%p305_p12)  ;;  %v358_v36 = vmax.f32 (!%p305_p12), %v341_v33, %v1174_v34  ;;  %v357_v41 = vmax.f32 (!%p305_p12), %v340_v38, %v1173_v39  ;;  %v1181_v42 = vld [vmem:[%s1624_s6 + $0x80] sm:$0xff] (!%p305_p12) }
  0x32   : > { %414 = vst.msk [vmem:[#allocation2 + $0x70] sm:$0x1] (!%p305_p12), %vm406_vm2, %v1423_v32  ;;  %415 = vst.msk [vmem:[#allocation2 + $0x80] sm:$0x1] (!%p305_p12), %vm406_vm2, %v1423_v32  ;;  %v1190_v37 = vld [vmem:[%s1624_s6 + $0xc8] sm:$0xff] (!%p305_p12)  ;;  %v1189_v43 = vld [vmem:[%s1624_s6 + $0xc0] sm:$0xff] (!%p305_p12) }
  0x33   : > { %418 = vst.msk [vmem:[#allocation2 + $0x19] sm:$0x1] (!%p305_p12), %vm406_vm2, %v1423_v32  ;;  %419 = vst.msk [vmem:[#allocation2 + $0x29] sm:$0x1] (!%p305_p12), %vm406_vm2, %v1423_v32  ;;  %v384_v40 = vmax.f32 (!%p305_p12), %v1182_v35, %v1190_v37  ;;  %v342_v44 = vld [vmem:[%s1624_s6 + $0x10] sm:$0xff] (!%p305_p12)  ;;  %v383_v45 = vmax.f32 (!%p305_p12), %v1181_v42, %v1189_v43  ;;  %v343_v53 = vld [vmem:[%s1624_s6 + $0x18] sm:$0xff] (!%p305_p12) }
  0x34   : > { %420 = vst.msk [vmem:[#allocation2 + $0x39] sm:$0x1] %vm406_vm2, %v1423_v32  ;;  %421 = vst.msk [vmem:[#allocation2 + $0x49] sm:$0x1] %vm406_vm2, %v1423_v32  ;;  %v1175_v46 = vld [vmem:[%s1624_s6 + $0x50] sm:$0xff]  ;;  %v1176_v54 = vld [vmem:[%s1624_s6 + $0x58] sm:$0xff] }
  0x35   : > { %422 = vst.msk [vmem:[#allocation2 + $0x59] sm:$0x1] %vm406_vm2, %v1423_v32  ;;  %423 = vst.msk [vmem:[#allocation2 + $0x69] sm:$0x1] %vm406_vm2, %v1423_v32  ;;  %v1183_v47 = vld [vmem:[%s1624_s6 + $0x90] sm:$0xff]  ;;  %v392_v50 = vmax.f32 %v358_v36, %v384_v40  ;;  %v359_v51 = vmax.f32 %v342_v44, %v1175_v46  ;;  %v391_v56 = vmax.f32 %v357_v41, %v383_v45  ;;  %v1184_v58 = vld [vmem:[%s1624_s6 + $0x98] sm:$0xff] }
  0x36   : > { %424 = vst.msk [vmem:[#allocation2 + $0x79] sm:$0x1] %vm406_vm2, %v1423_v32  ;;  %425 = vst.msk [vmem:[#allocation2 + $0x89] sm:$0x1] %vm406_vm2, %v1423_v32  ;;  %v1191_v48 = vld [vmem:[%s1624_s6 + $0xd0] sm:$0xff]  ;;  %v360_v57 = vmax.f32 %v343_v53, %v1176_v54  ;;  %v1192_v59 = vld [vmem:[%s1624_s6 + $0xd8] sm:$0xff] }
  0x37   : > { %407 = vst.msk [vmem:[#allocation2] sm:$0x1] %vm406_vm2, %v1423_v32  ;;  %417 = vst.msk [vmem:[#allocation2 + $0x9] sm:$0x1] %vm406_vm2, %v1423_v32  ;;  %v456_v49 = vld [vmem:[#allocation2 + $0x1] sm:$0xff]  ;;  %v385_v52 = vmax.f32 %v1183_v47, %v1191_v48  ;;  %v386_v61 = vmax.f32 %v1184_v58, %v1192_v59  ;;  %v344_v62 = vld [vmem:[%s1624_s6 + $0x20] sm:$0xff] }
  0x38   : > { %416 = vst.msk [vmem:[#allocation2 + $0x90] sm:$0x1] %vm406_vm2, %v1423_v32  ;;  %426 = vst.msk [vmem:[#allocation2 + $0x99] sm:$0x1] %vm406_vm2, %v1423_v32  ;;  %476 = vrot.lane.b32.xlu0 %v456_v49, %s1424_s7  ;;  %v1177_v63 = vld [vmem:[%s1624_s6 + $0x60] sm:$0xff]  ;;  %v345_v3 = vld [vmem:[%s1624_s6 + $0x28] sm:$0xff] }
  0x39   : > { %429 = vst.msk [vmem:[#allocation2 + $0x21] sm:$0xff] %vm399_vm0, %v392_v50  ;;  %v393_v60 = vmax.f32 %v359_v51, %v385_v52  ;;  %v1185_v0 = vld [vmem:[%s1624_s6 + $0xa0] sm:$0xff]  ;;  %428 = vst.msk [vmem:[#allocation2 + $0x11] sm:$0xff] %vm399_vm0, %v391_v56  ;;  %v361_v1 = vmax.f32 %v344_v62, %v1177_v63  ;;  %v1178_v4 = vld [vmem:[%s1624_s6 + $0x68] sm:$0xff]  ;;  %v394_v5 = vmax.f32 %v360_v57, %v386_v61  ;;  %vm506_vm5 = vcmask 64544   ;;  %s1171_s24 = sshll.u32 %s1613_s4, 6 }
  0x3a   : > { %v1193_v2 = vld [vmem:[%s1624_s6 + $0xe0] sm:$0xff]  ;;  %v362_v7 = vmax.f32 %v345_v3, %v1178_v4  ;;  %v1186_v8 = vld [vmem:[%s1624_s6 + $0xa8] sm:$0xff]  ;;  %v346_v10 = vld [vmem:[%s1624_s6 + $0x30] sm:$0xff]  ;;  %581 = vst.msk [vmem:[#allocation4 + $0x10] sm:$0xff] %vm578_vm4, %v1423_v32  ;;  %vm567_vm6 = vcmask 97344   ;;  %vm614_vm7 = vcmask 97280  }
  0x3b   : > { %430 = vst.msk [vmem:[#allocation2 + $0x31] sm:$0xff] %vm399_vm0, %v393_v60  ;;  %v387_v6 = vmax.f32 %v1185_v0, %v1193_v2  ;;  %v1194_v9 = vld [vmem:[%s1624_s6 + $0xe8] sm:$0xff]  ;;  %v1179_v12 = vld [vmem:[%s1624_s6 + $0x70] sm:$0xff]  ;;  %431 = vst.msk [vmem:[#allocation2 + $0x41] sm:$0xff] %vm399_vm0, %v394_v5  ;;  %s1788_s25 = scalar_lea.vmem [#allocation6], %s1171_s24  ;;  %s1224_s26 = sshll.u32 %s1470_s16, 10 }
  0x3c   : > { %v388_v11 = vmax.f32 %v1186_v8, %v1194_v9  ;;  %v1187_v13 = vld [vmem:[%s1624_s6 + $0xb0] sm:$0xff]  ;;  %v363_v16 = vmax.f32 %v346_v10, %v1179_v12  ;;  %v347_v18 = vld [vmem:[%s1624_s6 + $0x38] sm:$0xff]  ;;  %v1325_v48 = vld [vmem:[%s1909_s1 + $0x10] sm:$0x3f]   ;;  %579 = vst.msk [vmem:[#allocation4] sm:$0xff] %vm578_vm4, %v1423_v32  ;;  %s1050_s27 = sshll.u32 %s1788_s25, 4  ;;  %s1815_s30 = scalar_lea.hbm %s1910_s2, %s1224_s26  ;;  %s1819_s27 = int_to_ptr.vmem [resolvable:$true] %s1050_s27 }
  0x3d   : > { %v1195_v14 = vld [vmem:[%s1624_s6 + $0xf0] sm:$0xff]  ;;  %v395_v15 = vmax.f32 %v361_v1, %v387_v6  ;;  %v1180_v19 = vld [vmem:[%s1624_s6 + $0x78] sm:$0xff]  ;;  %v1698_v51 = vsel %vm627_vm3, %v1325_v48, 0  ;;  %v465_v59 = vld [vmem:[#allocation2 + $0x91] sm:$0xff]  ;;  %580 = vst.msk [vmem:[#allocation4 + $0x8] sm:$0xff] %vm578_vm4, %v1423_v32  ;;  %s1032_s5 = scalar_lea.sflag [#allocation7], %s1613_s4 }
  0x3e   : > { %v517_v55 = vld [vmem:[#allocation2 + $0x2] sm:$0xff]  ;;  %v389_v17 = vmax.f32 %v1187_v13, %v1195_v14  ;;  %v396_v21 = vmax.f32 %v362_v7, %v388_v11  ;;  %v364_v22 = vmax.f32 %v347_v18, %v1180_v19  ;;  %582 = vst.msk [vmem:[#allocation4 + $0x18] sm:$0xff] %vm578_vm4, %v1423_v32  ;;  %583 = vst.msk [vmem:[#allocation4 + $0x20] sm:$0xff] %vm578_vm4, %v1423_v32 }
  0x3f   : > { %537 = vrot.lane.b32.xlu0 %v517_v55, %s1425_s8  ;;  %v1188_v20 = vld [vmem:[%s1624_s6 + $0xb8] sm:$0xff]  ;;  %432 = vst.msk [vmem:[#allocation2 + $0x51] sm:$0xff] %vm399_vm0, %v395_v15  ;;  %v436_v26 = vld [vmem:[#allocation2] sm:$0xff]  ;;  %v445_v58 = vld [vmem:[#allocation2 + $0x90] sm:$0xff] }
  0x40   : > { %v1196_v23 = vld [vmem:[%s1624_s6 + $0xf8] sm:$0xff]  ;;  %v397_v24 = vmax.f32 %v363_v16, %v389_v17  ;;  %433 = vst.msk [vmem:[#allocation2 + $0x61] sm:$0xff] %vm399_vm0, %v396_v21  ;;  %446 = vst.msk [vmem:[#allocation3] sm:$0xff] %vm399_vm0, %v436_v26  ;;  %v438_v28 = vld [vmem:[#allocation2 + $0x20] sm:$0xff]  ;;  %s1327_s6 = scalar_lea.vmem %s1819_s27, 1024 }
  0x41   : > { %v390_v25 = vmax.f32 %v1188_v20, %v1196_v23  ;;  %v458_v27 = vld [vmem:[#allocation2 + $0x21] sm:$0xff]  ;;  %v457_v29 = vld [vmem:[#allocation2 + $0x11] sm:$0xff]  ;;  %448 = vst.msk [vmem:[#allocation3 + $0x10] sm:$0xff] %vm399_vm0, %v438_v28  ;;  %455 = vst.msk [vmem:[#allocation3 + $0x48] sm:$0xff] %vm399_vm0, %v445_v58  ;;  %p1328_p13 = scmp.ne.s32.totalorder %s1819_s27, %s1327_s6 }
  0x42   : > { %480 = vrot.lane.b32.xlu1 %v458_v27, %s1424_s7  ;;  %434 = vst.msk [vmem:[#allocation2 + $0x71] sm:$0xff] %vm399_vm0, %v397_v24  ;;  %v437_v31 = vld [vmem:[#allocation2 + $0x10] sm:$0xff]  ;;  %v460_v35 = vld [vmem:[#allocation2 + $0x41] sm:$0xff] }
  0x43   : > { %v398_v30 = vmax.f32 %v364_v22, %v390_v25  ;;  %478 = vrot.lane.b32.xlu0 %v457_v29, %s1424_s7  ;;  %v459_v33 = vld [vmem:[#allocation2 + $0x31] sm:$0xff]  ;;  %447 = vst.msk [vmem:[#allocation3 + $0x8] sm:$0xff] %vm399_vm0, %v437_v31  ;;  %v440_v36 = vld [vmem:[#allocation2 + $0x40] sm:$0xff]  ;;  %v1326_v54 = vld [vmem:[%s1909_s1 + $0x8] sm:$0x3f]   ;;  %p1329_p0 = pnand %p1328_p13, %p1488_p6 }
  0x44   : > { %v439_v34 = vld [vmem:[#allocation2 + $0x30] sm:$0xff]  ;;  %450 = vst.msk [vmem:[#allocation3 + $0x20] sm:$0xff] %vm399_vm0, %v440_v36  ;;  %v519_v39 = vld [vmem:[#allocation2 + $0x22] sm:$0xff]  ;;  %v1709_v57 = vsel %vm627_vm3, %v1326_v54, 0 }
  0x45   : > { %435 = vst.msk [vmem:[#allocation2 + $0x81] sm:$0xff] %vm399_vm0, %v398_v30  ;;  %449 = vst.msk [vmem:[#allocation3 + $0x18] sm:$0xff] %vm399_vm0, %v439_v34  ;;  %v518_v37 = vld [vmem:[#allocation2 + $0x12] sm:$0xff]  ;;  %v1324_v42 = vld [vmem:[%s1909_s1] sm:$0x3f]   ;;  %p1330_p1 = pneg %p1329_p0 }
  0x46   : > { %482 = vrot.lane.b32.xlu1 %v459_v33, %s1424_s7  ;;  %v441_v38 = vld [vmem:[#allocation2 + $0x50] sm:$0xff]  ;;  %1272 = vmatprep.subr.msk.bf16.mxu0 %vm627_vm3, %v1324_v42  ;;  %v629_v45 = vsel %vm627_vm3, %v1324_v42, 0  ;;  %v521_v47 = vld [vmem:[#allocation2 + $0x42] sm:$0xff]  ;;  %584 = vst.msk [vmem:[#allocation4 + $0x28] sm:$0xff] %vm578_vm4, %v1423_v32  ;;  %585 = vst.msk [vmem:[#allocation4 + $0x30] sm:$0xff] %vm578_vm4, %v1423_v32 }
  0x47   : > { %484 = vrot.lane.b32.xlu0 %v460_v35, %s1424_s7  ;;  %451 = vst.msk [vmem:[#allocation3 + $0x28] sm:$0xff] %vm399_vm0, %v441_v38  ;;  %v442_v40 = vld [vmem:[#allocation2 + $0x60] sm:$0xff]  ;;  %v461_v43 = vld [vmem:[#allocation2 + $0x51] sm:$0xff]  ;;  %1273 = vmatprep.subr.msk.bf16.mxu1 %vm627_vm3, %v1324_v42 }
  0x48   : > { %452 = vst.msk [vmem:[#allocation3 + $0x30] sm:$0xff] %vm399_vm0, %v442_v40  ;;  %v462_v44 = vld [vmem:[#allocation2 + $0x61] sm:$0xff]  ;;  %1241 = vmatpush3.bf16.msra.mxu0 %v629_v45  ;;  %1271 = vmatpush3.bf16.msra.mxu1 %v629_v45  ;;  %v520_v46 = vld [vmem:[#allocation2 + $0x32] sm:$0xff] }
  0x49   : > { %v443_v41 = vld [vmem:[#allocation2 + $0x70] sm:$0xff]  ;;  %1275 = vmatprep.subr.msk.bf16.mxu0 %vm627_vm3, %v1325_v48  ;;  %v523_v52 = vld [vmem:[#allocation2 + $0x62] sm:$0xff]  ;;  %1274 = vmatprep.subr.msk.bf16.mxu1 %vm627_vm3, %v1326_v54  ;;  %586 = vst.msk [vmem:[#allocation4 + $0x38] sm:$0xff] %vm578_vm4, %v1423_v32 }
  0x4a   : > { %539 = vrot.lane.b32.xlu1 %v518_v37, %s1425_s8  ;;  %453 = vst.msk [vmem:[#allocation3 + $0x38] sm:$0xff] %vm399_vm0, %v443_v41  ;;  %v463_v50 = vld [vmem:[#allocation2 + $0x71] sm:$0xff]  ;;  %v597_v37 = vld [vmem:[#allocation4 + $0x10] sm:$0xff]  ;;  %v598_v40 = vld [vmem:[#allocation4 + $0x18] sm:$0xff] }
  0x4b   : > { %541 = vrot.lane.b32.xlu0 %v519_v39, %s1425_s8  ;;  %v522_v53 = vld [vmem:[#allocation2 + $0x52] sm:$0xff] }
  0x4c   : > { %v444_v49 = vld [vmem:[#allocation2 + $0x80] sm:$0xff]  ;;  %v524_v56 = vld [vmem:[#allocation2 + $0x72] sm:$0xff] }
  0x4d   : > { %454 = vst.msk [vmem:[#allocation3 + $0x40] sm:$0xff] %vm399_vm0, %v444_v49  ;;  %v464_v55 = vld [vmem:[#allocation2 + $0x81] sm:$0xff]  ;;  %v526_v61 = vld [vmem:[#allocation2 + $0x92] sm:$0xff] }
  0x4e   : > { %486 = vrot.lane.b32.xlu1 %v461_v43, %s1424_s7  ;;  %v525_v60 = vld [vmem:[#allocation2 + $0x82] sm:$0xff]  ;;  %v595_v38 = vld [vmem:[#allocation4] sm:$0xff]  ;;  %v596_v43 = vld [vmem:[#allocation4 + $0x8] sm:$0xff] }
  0x4f   : > { %488 = vrot.lane.b32.xlu0 %v462_v44, %s1424_s7  ;;  %v599_v54 = vld [vmem:[#allocation4 + $0x20] sm:$0xff] }
  0x52   : > { %543 = vrot.lane.b32.xlu1 %v520_v46, %s1425_s8 }
  0x53   : > { %545 = vrot.lane.b32.xlu0 %v521_v47, %s1425_s8 }
  0x56   : > { %490 = vrot.lane.b32.xlu1 %v463_v50, %s1424_s7 }
  0x57   : > { %549 = vrot.lane.b32.xlu0 %v523_v52, %s1425_s8  ;;  %v601_v52 = vld [vmem:[#allocation4 + $0x30] sm:$0xff] }
  0x5a   : > { %547 = vrot.lane.b32.xlu1 %v522_v53, %s1425_s8 }
  0x5b   : > { %492 = vrot.lane.b32.xlu0 %v464_v55, %s1424_s7 }
  0x5e   : > { %551 = vrot.lane.b32.xlu1 %v524_v56, %s1425_s8  ;;  %v602_v56 = vld [vmem:[#allocation4 + $0x38] sm:$0xff] }
  0x5f   : > { %494 = vrot.lane.b32.xlu0 %v465_v59, %s1424_s7  ;;  %v600_v59 = vld [vmem:[#allocation4 + $0x28] sm:$0xff]  ;;  %s1426_s7 = smov [#allocation6]  }
  0x60   : > { %s1331_s9 = sshll.u32 %s1426_s7, 4  ;;  %s1332_s9 = int_to_ptr.vmem [resolvable:$false] %s1331_s9 }
  0x61   : > { %s1333_s10 = scalar_lea.vmem %s1332_s9, 2048  ;;  %p1334_p2 = scmp.lt.s32.totalorder %s1819_s27, %s1332_s9 }
  0x62   : > { %553 = vrot.lane.b32.xlu1 %v525_v60, %s1425_s8  ;;  %p1335_p3 = scmp.lt.s32.totalorder %s1333_s10, %s1327_s6 }
  0x64   : > { %p1336_p4 = por %p1335_p3, %p1334_p2 }
  0x66   : > { %555 = vrot.lane.b32.xlu1 %v526_v61, %s1425_s8  ;;  %p1337_p5 = pnand %p1336_p4, %p1330_p1 }
  0xaa   : > { %v477_v62 = vpop.permute.xlu0 %476 }
  0xab   : > { %507 = vst.msk [vmem:[#allocation3] sm:$0xff] %vm506_vm5, %v477_v62 }
  0xb1   : > { %v538_v63 = vpop.permute.xlu0 %537 }
  0xb2   : > { %568 = vst.msk [vmem:[#allocation3] sm:$0xff] %vm567_vm6, %v538_v63 }
  0xb4   : > { %v481_v0 = vpop.permute.xlu1 %480 }
  0xb5   : > { %509 = vst.msk [vmem:[#allocation3 + $0x10] sm:$0xff] %vm506_vm5, %v481_v0  ;;  %v479_v1 = vpop.permute.xlu0 %478 }
  0xb6   : > { %508 = vst.msk [vmem:[#allocation3 + $0x8] sm:$0xff] %vm506_vm5, %v479_v1 }
  0xb8   : > { %v483_v2 = vpop.permute.xlu1 %482 }
  0xb9   : > { %510 = vst.msk [vmem:[#allocation3 + $0x18] sm:$0xff] %vm506_vm5, %v483_v2  ;;  %v485_v3 = vpop.permute.xlu0 %484  ;;  %v587_v8 = vld [vmem:[#allocation3] sm:$0xff] }
  0xba   : > { %511 = vst.msk [vmem:[#allocation3 + $0x20] sm:$0xff] %vm506_vm5, %v485_v3 }
  0xbc   : > { %v540_v32 = vpop.permute.xlu1 %539 }
  0xbd   : > { %569 = vst.msk [vmem:[#allocation3 + $0x8] sm:$0xff] %vm567_vm6, %v540_v32  ;;  %v542_v4 = vpop.permute.xlu0 %541 }
  0xbe   : > { %570 = vst.msk [vmem:[#allocation3 + $0x10] sm:$0xff] %vm567_vm6, %v542_v4 }
  0xc0   : > { %v487_v5 = vpop.permute.xlu1 %486 }
  0xc1   : > { %512 = vst.msk [vmem:[#allocation3 + $0x28] sm:$0xff] %vm506_vm5, %v487_v5  ;;  %v489_v6 = vpop.permute.xlu0 %488 }
  0xc2   : > { %513 = vst.msk [vmem:[#allocation3 + $0x30] sm:$0xff] %vm506_vm5, %v489_v6 }
  0xc4   : > { %v544_v7 = vpop.permute.xlu1 %543  ;;  %v588_v9 = vld [vmem:[#allocation3 + $0x8] sm:$0xff] }
  0xc5   : > { %571 = vst.msk [vmem:[#allocation3 + $0x18] sm:$0xff] %vm567_vm6, %v544_v7  ;;  %v546_v10 = vpop.permute.xlu0 %545  ;;  %v603_v11 = vpack.c.bf16 %v588_v9, %v587_v8  ;;  %v589_v15 = vld [vmem:[#allocation3 + $0x10] sm:$0xff] }
  0xc6   : > { %572 = vst.msk [vmem:[#allocation3 + $0x20] sm:$0xff] %vm567_vm6, %v546_v10  ;;  %v729_v29 = vpack.c.bf16 %v589_v15, %v588_v9 }
  0xc7   : > { %1242 = vmatprep.mubr.msk.bf16.mxu0 %vm614_vm7, %v603_v11 }
  0xc8   : > { %v491_v12 = vpop.permute.xlu1 %490 }
  0xc9   : > { %514 = vst.msk [vmem:[#allocation3 + $0x38] sm:$0xff] %vm506_vm5, %v491_v12  ;;  %v550_v13 = vpop.permute.xlu0 %549 }
  0xca   : > { %574 = vst.msk [vmem:[#allocation3 + $0x30] sm:$0xff] %vm567_vm6, %v550_v13 }
  0xcc   : > { %v548_v14 = vpop.permute.xlu1 %547  ;;  %v590_v16 = vld [vmem:[#allocation3 + $0x18] sm:$0xff] }
  0xcd   : > { %573 = vst.msk [vmem:[#allocation3 + $0x28] sm:$0xff] %vm567_vm6, %v548_v14  ;;  %v604_v17 = vpack.c.bf16 %v590_v16, %v589_v15  ;;  %v493_v18 = vpop.permute.xlu0 %492  ;;  %v591_v22 = vld [vmem:[#allocation3 + $0x20] sm:$0xff] }
  0xce   : > { %515 = vst.msk [vmem:[#allocation3 + $0x40] sm:$0xff] %vm506_vm5, %v493_v18  ;;  %v730_v33 = vpack.c.bf16 %v591_v22, %v590_v16 }
  0xcf   : > { %1243 = vmatmul.mubr.msk.bf16.vlgmr.msra.gmra.mrb[0].mxu0 %vm614_vm7, %v604_v17 }
  0xd0   : > { %v552_v19 = vpop.permute.xlu1 %551  ;;  %1262 = vmatprep.mubr.msk.bf16.mxu0 %vm614_vm7, %v604_v17  ;;  %1261 = vmatpush3.bf16.msra.mxu0 %v1698_v51 }
  0xd1   : > { %575 = vst.msk [vmem:[#allocation3 + $0x38] sm:$0xff] %vm567_vm6, %v552_v19  ;;  %v495_v20 = vpop.permute.xlu0 %494  ;;  %v593_v25 = vld [vmem:[#allocation3 + $0x30] sm:$0xff] }
  0xd2   : > { %516 = vst.msk [vmem:[#allocation3 + $0x48] sm:$0xff] %vm506_vm5, %v495_v20 }
  0xd4   : > { %v554_v21 = vpop.permute.xlu1 %553  ;;  %v592_v23 = vld [vmem:[#allocation3 + $0x28] sm:$0xff] }
  0xd5   : > { %576 = vst.msk [vmem:[#allocation3 + $0x40] sm:$0xff] %vm567_vm6, %v554_v21  ;;  %v605_v24 = vpack.c.bf16 %v592_v23, %v591_v22  ;;  %v731_v35 = vpack.c.bf16 %v593_v25, %v592_v23 }
  0xd7   : > { %1246 = vmatprep.mubr.msk.bf16.mxu1 %vm614_vm7, %v605_v24  ;;  %1263 = vmatmul.mubr.msk.bf16.vlgmr.msra.gmra.mrb[4].mxu0 %vm614_vm7, %v605_v24 }
  0xd8   : > { %v594_v26 = vld [vmem:[#allocation3 + $0x38] sm:$0xff]  ;;  %v556_v27 = vpop.permute.xlu1 %555 }
  0xd9   : > { %v606_v28 = vpack.c.bf16 %v594_v26, %v593_v25  ;;  %577 = vst.msk [vmem:[#allocation3 + $0x48] sm:$0xff] %vm567_vm6, %v556_v27 }
  0xdb   : > { %1247 = vmatmul.mubr.msk.bf16.vlgmr.msra.gmra.mrb[0].mxu1 %vm614_vm7, %v606_v28  ;;  %1266 = vmatprep.mubr.msk.bf16.mxu0 %vm614_vm7, %v606_v28 }
  0xdc   : > { %1251 = vmatpush3.bf16.msra.mxu1 %v1709_v57  ;;  %1252 = vmatprep.mubr.msk.bf16.mxu1 %vm614_vm7, %v729_v29  ;;  %v844_v30 = vld [vmem:[#allocation3 + $0x40] sm:$0xff] }
  0xdd   : > { %v732_v36 = vpack.c.bf16 %v844_v30, %v594_v26 }
  0xe0   : > { %v845_v31 = vld [vmem:[#allocation3 + $0x48] sm:$0xff] }
  0xe1   : > { %v857_v34 = vpack.c.bf16 %v845_v31, %v844_v30 }
  0xe3   : > { %1253 = vmatmul.mubr.msk.bf16.vlgmr.msra.gmra.mrb[4].mxu1 %vm614_vm7, %v730_v33  ;;  %1267 = vmatmul.mubr.msk.bf16.gmra.mrb[8].mxu0 %vm614_vm7, %v857_v34 }
  0xe4   : > { %1256 = vmatprep.mubr.msk.bf16.mxu1 %vm614_vm7, %v731_v35 }
  0xeb   : > { %1257 = vmatmul.mubr.msk.bf16.gmra.mrb[8].mxu1 %vm614_vm7, %v732_v36 }
 0x1a2   : > { %v1244_v39 = vpop.f32.mrb[0].mxu0 }
 0x1a3   : > { %v698_v41 = vadd.f32 %v1244_v39, %v597_v37  ;;  %v665_v42 = vpop.f32.mrb[1].mxu0 }
 0x1a4   : > { %v696_v44 = vadd.f32 %v665_v42, %v595_v38  ;;  %v1245_v45 = vpop.f32.mrb[2].mxu0 }
 0x1a5   : > { %706 = vst.msk [vmem:[#allocation4 + $0x10] sm:$0xff] %vm578_vm4, %v698_v41  ;;  %v699_v46 = vadd.f32 %v1245_v45, %v598_v40  ;;  %v668_v47 = vpop.f32.mrb[3].mxu0 }
 0x1a6   : > { %704 = vst.msk [vmem:[#allocation4] sm:$0xff] %vm578_vm4, %v696_v44  ;;  %v697_v48 = vadd.f32 %v668_v47, %v596_v43 }
 0x1a7   : > { %707 = vst.msk [vmem:[#allocation4 + $0x18] sm:$0xff] %vm578_vm4, %v699_v46 }
 0x1a8   : > { %705 = vst.msk [vmem:[#allocation4 + $0x8] sm:$0xff] %vm578_vm4, %v697_v48 }
 0x1aa   : > { %v1264_v49 = vpop.f32.mrb[4].mxu0 }
 0x1ab   : > { %v915_v50 = vpop.f32.mrb[5].mxu0 }
 0x1ac   : > { %v1265_v51 = vpop.f32.mrb[6].mxu0  ;;  %v723_v1 = vld [vmem:[#allocation4 + $0x10] sm:$0xff] }
 0x1ad   : > { %v918_v53 = vpop.f32.mrb[7].mxu0  ;;  %v721_v4 = vld [vmem:[#allocation4] sm:$0xff] }
 0x1ae   : > { %v1248_v55 = vpop.f32.mrb[0].mxu1  ;;  %v724_v8 = vld [vmem:[#allocation4 + $0x18] sm:$0xff] }
 0x1af   : > { %v702_v57 = vadd.f32 %v1248_v55, %v601_v52  ;;  %v681_v58 = vpop.f32.mrb[1].mxu1  ;;  %v722_v12 = vld [vmem:[#allocation4 + $0x8] sm:$0xff] }
 0x1b0   : > { %v700_v60 = vadd.f32 %v681_v58, %v599_v54  ;;  %v1249_v61 = vpop.f32.mrb[2].mxu1 }
 0x1b1   : > { %710 = vst.msk [vmem:[#allocation4 + $0x30] sm:$0xff] %vm578_vm4, %v702_v57  ;;  %v703_v62 = vadd.f32 %v1249_v61, %v602_v56  ;;  %v684_v63 = vpop.f32.mrb[3].mxu1 }
 0x1b2   : > { %708 = vst.msk [vmem:[#allocation4 + $0x20] sm:$0xff] %vm578_vm4, %v700_v60  ;;  %v701_v0 = vadd.f32 %v684_v63, %v600_v59 }
 0x1b3   : > { %711 = vst.msk [vmem:[#allocation4 + $0x38] sm:$0xff] %vm578_vm4, %v703_v62 }
 0x1b4   : > { %709 = vst.msk [vmem:[#allocation4 + $0x28] sm:$0xff] %vm578_vm4, %v701_v0 }
 0x1b6   : > { %v1254_v2 = vpop.f32.mrb[4].mxu1  ;;  %v1268_v3 = vpop.f32.mrb[8].mxu0 }
 0x1b7   : > { %v823_v32 = vadd.f32 %v1254_v2, %v723_v1  ;;  %v790_v5 = vpop.f32.mrb[5].mxu1  ;;  %v931_v6 = vpop.f32.mrb[9].mxu0 }
 0x1b8   : > { %v821_v7 = vadd.f32 %v790_v5, %v721_v4  ;;  %v1255_v9 = vpop.f32.mrb[6].mxu1  ;;  %v1269_v10 = vpop.f32.mrb[10].mxu0  ;;  %v727_v16 = vld [vmem:[#allocation4 + $0x30] sm:$0xff] }
 0x1b9   : > { %831 = vst.msk [vmem:[#allocation4 + $0x10] sm:$0xff] %vm578_vm4, %v823_v32  ;;  %v824_v11 = vadd.f32 %v1255_v9, %v724_v8  ;;  %v793_v13 = vpop.f32.mrb[7].mxu1  ;;  %v934_v14 = vpop.f32.mrb[11].mxu0  ;;  %v725_v19 = vld [vmem:[#allocation4 + $0x20] sm:$0xff] }
 0x1ba   : > { %829 = vst.msk [vmem:[#allocation4] sm:$0xff] %vm578_vm4, %v821_v7  ;;  %v822_v15 = vadd.f32 %v793_v13, %v722_v12  ;;  %v728_v23 = vld [vmem:[#allocation4 + $0x38] sm:$0xff] }
 0x1bb   : > { %832 = vst.msk [vmem:[#allocation4 + $0x18] sm:$0xff] %vm578_vm4, %v824_v11  ;;  %v726_v28 = vld [vmem:[#allocation4 + $0x28] sm:$0xff] }
 0x1bc   : > { %830 = vst.msk [vmem:[#allocation4 + $0x8] sm:$0xff] %vm578_vm4, %v822_v15 }
 0x1be   : > { %v1258_v17 = vpop.f32.mrb[8].mxu1 }
 0x1bf   : > { %v827_v18 = vadd.f32 %v1258_v17, %v727_v16  ;;  %v806_v20 = vpop.f32.mrb[9].mxu1 }
 0x1c0   : > { %v848_v21 = vld [vmem:[#allocation4 + $0x10] sm:$0xff]  ;;  %v825_v22 = vadd.f32 %v806_v20, %v725_v19  ;;  %v1259_v24 = vpop.f32.mrb[10].mxu1 }
 0x1c1   : > { %v948_v25 = vadd.f32 %v1264_v49, %v848_v21  ;;  %v846_v26 = vld [vmem:[#allocation4] sm:$0xff]  ;;  %835 = vst.msk [vmem:[#allocation4 + $0x30] sm:$0xff] %vm578_vm4, %v827_v18  ;;  %v828_v27 = vadd.f32 %v1259_v24, %v728_v23  ;;  %v809_v29 = vpop.f32.mrb[11].mxu1 }
 0x1c2   : > { %v946_v30 = vadd.f32 %v915_v50, %v846_v26  ;;  %v849_v31 = vld [vmem:[#allocation4 + $0x18] sm:$0xff]  ;;  %833 = vst.msk [vmem:[#allocation4 + $0x20] sm:$0xff] %vm578_vm4, %v825_v22  ;;  %v826_v33 = vadd.f32 %v809_v29, %v726_v28 }
 0x1c3   : > { %956 = vst.msk [vmem:[#allocation4 + $0x10] sm:$0xff] %vm578_vm4, %v948_v25  ;;  %v949_v34 = vadd.f32 %v1265_v51, %v849_v31  ;;  %v847_v35 = vld [vmem:[#allocation4 + $0x8] sm:$0xff]  ;;  %836 = vst.msk [vmem:[#allocation4 + $0x38] sm:$0xff] %vm578_vm4, %v828_v27 }
 0x1c4   : > { %954 = vst.msk [vmem:[#allocation4] sm:$0xff] %vm578_vm4, %v946_v30  ;;  %v947_v36 = vadd.f32 %v918_v53, %v847_v35  ;;  %834 = vst.msk [vmem:[#allocation4 + $0x28] sm:$0xff] %vm578_vm4, %v826_v33 }
 0x1c5   : > { %957 = vst.msk [vmem:[#allocation4 + $0x18] sm:$0xff] %vm578_vm4, %v949_v34 }
 0x1c6   : > { %955 = vst.msk [vmem:[#allocation4 + $0x8] sm:$0xff] %vm578_vm4, %v947_v36 }
 0x1c8   : > { %v852_v37 = vld [vmem:[#allocation4 + $0x30] sm:$0xff] }
 0x1c9   : > { %v952_v38 = vadd.f32 %v1268_v3, %v852_v37  ;;  %v850_v39 = vld [vmem:[#allocation4 + $0x20] sm:$0xff] }
 0x1ca   : > { %v964_v40 = vld [vmem:[#allocation4 + $0x10] sm:$0xff]  ;;  %v950_v41 = vadd.f32 %v931_v6, %v850_v39  ;;  %v853_v42 = vld [vmem:[#allocation4 + $0x38] sm:$0xff] }
 0x1cb   : > { %v962_v43 = vld [vmem:[#allocation4] sm:$0xff]  ;;  %960 = vst.msk [vmem:[#allocation4 + $0x30] sm:$0xff] %vm578_vm4, %v952_v38  ;;  %v953_v44 = vadd.f32 %v1269_v10, %v853_v42  ;;  %v851_v45 = vld [vmem:[#allocation4 + $0x28] sm:$0xff]  ;;  %1025 = vst.msk [vmem:[%s1788_s25 + $0x10] sm:$0xff] %vm578_vm4, %v964_v40  ;;  %v995_v53 = vmul.f32 %v964_v40, %v964_v40  ;;  %v973_v55 = vsel %vm578_vm4, %v964_v40, 0.0 }
 0x1cc   : > { %v965_v46 = vld [vmem:[#allocation4 + $0x18] sm:$0xff]  ;;  %958 = vst.msk [vmem:[#allocation4 + $0x20] sm:$0xff] %vm578_vm4, %v950_v41  ;;  %v951_v47 = vadd.f32 %v934_v14, %v851_v45  ;;  %1023 = vst.msk [vmem:[%s1788_s25] sm:$0xff] %vm578_vm4, %v962_v43  ;;  %v993_v48 = vmul.f32 %v962_v43, %v962_v43  ;;  %v970_v50 = vsel %vm578_vm4, %v962_v43, 0.0 }
 0x1cd   : > { %v963_v49 = vld [vmem:[#allocation4 + $0x8] sm:$0xff]  ;;  %961 = vst.msk [vmem:[#allocation4 + $0x38] sm:$0xff] %vm578_vm4, %v953_v44  ;;  %1026 = vst.msk [vmem:[%s1788_s25 + $0x18] sm:$0xff] %vm578_vm4, %v965_v46  ;;  %v996_v56 = vmul.f32 %v965_v46, %v965_v46  ;;  %v975_v62 = vsel %vm578_vm4, %v965_v46, 0.0  ;;  %v1004_v63 = vsel %vm578_vm4, %v995_v53, 0.0 }
 0x1ce   : > { %959 = vst.msk [vmem:[#allocation4 + $0x28] sm:$0xff] %vm578_vm4, %v951_v47  ;;  %1024 = vst.msk [vmem:[%s1788_s25 + $0x8] sm:$0xff] %vm578_vm4, %v963_v49  ;;  %v971_v51 = vsel %vm578_vm4, %v963_v49, 0.0  ;;  %v994_v52 = vmul.f32 %v963_v49, %v963_v49  ;;  %v1001_v57 = vsel %vm578_vm4, %v993_v48, 0.0 }
 0x1cf   : > { %v972_v54 = vadd.f32 %v971_v51, %v970_v50  ;;  %v1006_v5 = vsel %vm578_vm4, %v996_v56, 0.0 }
 0x1d0   : > { %v1002_v58 = vsel %vm578_vm4, %v994_v52, 0.0 }
 0x1d1   : > { %v974_v59 = vadd.f32 %v973_v55, %v972_v54  ;;  %v1003_v60 = vadd.f32 %v1002_v58, %v1001_v57 }
 0x1d2   : > { %v968_v61 = vld [vmem:[#allocation4 + $0x30] sm:$0xff] }
 0x1d3   : > { %v966_v0 = vld [vmem:[#allocation4 + $0x20] sm:$0xff]  ;;  %1029 = vst.msk [vmem:[%s1788_s25 + $0x30] sm:$0xff] %vm578_vm4, %v968_v61  ;;  %v976_v1 = vadd.f32 %v975_v62, %v974_v59  ;;  %v1005_v2 = vadd.f32 %v1004_v63, %v1003_v60  ;;  %v999_v11 = vmul.f32 %v968_v61, %v968_v61 }
 0x1d4   : > { %v969_v3 = vld [vmem:[#allocation4 + $0x38] sm:$0xff]  ;;  %1027 = vst.msk [vmem:[%s1788_s25 + $0x20] sm:$0xff] %vm578_vm4, %v966_v0  ;;  %v977_v32 = vsel %vm578_vm4, %v966_v0, 0.0  ;;  %v997_v4 = vmul.f32 %v966_v0, %v966_v0 }
 0x1d5   : > { %v967_v6 = vld [vmem:[#allocation4 + $0x28] sm:$0xff]  ;;  %1030 = vst.msk [vmem:[%s1788_s25 + $0x38] sm:$0xff] %vm578_vm4, %v969_v3  ;;  %v978_v7 = vadd.f32 %v977_v32, %v976_v1  ;;  %v1007_v8 = vadd.f32 %v1006_v5, %v1005_v2 }
 0x1d6   : > { %1028 = vst.msk [vmem:[%s1788_s25 + $0x28] sm:$0xff] %vm578_vm4, %v967_v6  ;;  %v979_v9 = vsel %vm578_vm4, %v967_v6, 0.0  ;;  %v998_v10 = vmul.f32 %v967_v6, %v967_v6  ;;  %v1008_v12 = vsel %vm578_vm4, %v997_v4, 0.0 }
 0x1d7   : > { %1340 = shalt.err (!%p1337_p5)
}
 0x1d8   : > { %s1341_s11 = scalar_lea.hbm %s1815_s30, 1024  ;;  %s1345_s20 = scalar_lea.hbm %s1910_s2, 2048 }
 0x1d9   : > { %p1342_p7 = scmp.ne.s32.totalorder %s1815_s30, %s1341_s11  ;;  %p1346_p12 = scmp.lt.u32.totalorder %s1815_s30, %s1910_s2 }
 0x1da   : > { %p1347_p13 = scmp.lt.u32.totalorder %s1345_s20, %s1341_s11  ;;  %p1349_p1 = scmp.lt.u32.totalorder %s1341_s11, %s1815_s30 }
 0x1db   : > { %p1343_p10 = pnand %p1342_p7, %p1488_p6 }
 0x1dc   : > { %p1348_p0 = por %p1347_p13, %p1346_p12 }
 0x1dd   : > { %p1344_p11 = pneg %p1343_p10 }
 0x1de   : > { %p1350_p2 = por %p1349_p1, %p1348_p0 }
 0x1e0   : > { %p1351_p3 = pnand %p1350_p2, %p1344_p11 }
 0x1e2   : > { %1354 = shalt.err (!%p1351_p3)
}
 0x1e3   : > { %s1427_s26 = smov 128   ;;  %v980_v13 = vadd.f32 %v979_v9, %v978_v7  ;;  %v1009_v14 = vadd.f32 %v1008_v12, %v1007_v8  ;;  %v981_v15 = vsel %vm578_vm4, %v968_v61, 0.0  ;;  %v1000_v16 = vmul.f32 %v969_v3, %v969_v3  ;;  %s1037_s7 = scalar_lea.sflag [#allocation9], %s1613_s4 }
 0x1e4   : > { %1276 = dma.vmem_to_hbm [thread:$0]  (%p1488_p6), %s1819_s27, 1024, %s1815_s30, %s1032_s5, %s1427_s26, %s1427_s26, %s1425_s8   ;;  %v1010_v17 = vsel %vm578_vm4, %v998_v10, 0.0  ;;  %v983_v20 = vsel %vm578_vm4, %v969_v3, 0.0  ;;  %v1012_v21 = vsel %vm578_vm4, %v999_v11, 0.0  ;;  %vm991_vm8 = vcmask 57344  }
 0x1e5   : > { %v982_v18 = vadd.f32 %v981_v15, %v980_v13  ;;  %v1011_v19 = vadd.f32 %v1010_v17, %v1009_v14  ;;  %v1014_v24 = vsel %vm578_vm4, %v1000_v16, 0.0  ;;  %s1172_s8 = sshll.u32 %s1613_s4, 1  ;;  %s1220_s27 = sshll.u32 %s1470_s16, 5 }
 0x1e6   : > { %s338_s28 = scalar_lea.vmem [#allocation8], %s1172_s8  ;;  %s1864_s6 = scalar_lea.hbm %s1911_s3, %s1220_s27 }
 0x1e7   : > { %v984_v22 = vadd.f32 %v983_v20, %v982_v18  ;;  %v1013_v23 = vadd.f32 %v1012_v21, %v1011_v19  ;;  %s1066_s29 = sshll.u32 %s338_s28, 4  ;;  %s1428_s16 = smov [#allocation8]   ;;  %s1866_s29 = int_to_ptr.vmem [resolvable:$true] %s1066_s29 }
 0x1e8   : > { %s1355_s9 = scalar_lea.vmem %s1866_s29, 32  ;;  %s1359_s10 = sshll.u32 %s1428_s16, 4  ;;  %s1360_s10 = int_to_ptr.vmem [resolvable:$false] %s1359_s10 }
 0x1e9   : > { %v985_v25 = vrot.slane %v984_v22, 4  ;;  %v1015_v26 = vadd.f32 %v1014_v24, %v1013_v23  ;;  %p1356_p4 = scmp.ne.s32.totalorder %s1866_s29, %s1355_s9  ;;  %s1361_s11 = scalar_lea.vmem %s1360_s10, 64 }
 0x1ea   : > { %p1362_p10 = scmp.lt.s32.totalorder %s1866_s29, %s1360_s10  ;;  %p1363_p11 = scmp.lt.s32.totalorder %s1361_s11, %s1355_s9 }
 0x1eb   : > { %v986_v27 = vadd.f32 %v985_v25, %v984_v22  ;;  %v1016_v28 = vrot.slane %v1015_v26, 4  ;;  %p1357_p5 = pnand %p1356_p4, %p1488_p6 }
 0x1ec   : > { %p1364_p12 = por %p1363_p11, %p1362_p10 }
 0x1ed   : > { %v987_v29 = vrot.slane %v986_v27, 2  ;;  %v1017_v30 = vadd.f32 %v1016_v28, %v1015_v26  ;;  %p1358_p7 = pneg %p1357_p5 }
 0x1ef   : > { %v988_v31 = vadd.f32 %v987_v29, %v986_v27  ;;  %v1018_v33 = vrot.slane %v1017_v30, 2  ;;  %p1365_p13 = pnand %p1364_p12, %p1358_p7 }
 0x1f1   : > { %v989_v34 = vrot.slane %v988_v31, 1  ;;  %v1019_v35 = vadd.f32 %v1018_v33, %v1017_v30 }
 0x1f3   : > { %v990_v36 = vadd.f32 %v989_v34, %v988_v31  ;;  %v1020_v37 = vrot.slane %v1019_v35, 1 }
 0x1f5   : > { %992 = vst.msk [vmem:[%s338_s28] sm:$0x1] %vm991_vm8, %v990_v36  ;;  %v1021_v38 = vadd.f32 %v1020_v37, %v1019_v35 }
 0x1f7   : > { %1022 = vst.msk [vmem:[%s338_s28 + $0x1] sm:$0x1] %vm991_vm8, %v1021_v38 }
 0x1f8   : > { %1368 = shalt.err (!%p1365_p13)
}
 0x1f9   : > { %s1369_s4 = scalar_lea.hbm %s1864_s6, 32  ;;  %s1373_s20 = scalar_lea.hbm %s1911_s3, 64 }
 0x1fa   : > { %p1370_p0 = scmp.ne.s32.totalorder %s1864_s6, %s1369_s4  ;;  %p1374_p3 = scmp.lt.u32.totalorder %s1864_s6, %s1911_s3 }
 0x1fb   : > { %p1375_p4 = scmp.lt.u32.totalorder %s1373_s20, %s1369_s4  ;;  %p1377_p7 = scmp.lt.u32.totalorder %s1369_s4, %s1864_s6 }
 0x1fc   : > { %p1371_p1 = pnand %p1370_p0, %p1488_p6 }
 0x1fd   : > { %p1376_p5 = por %p1375_p4, %p1374_p3 }
 0x1fe   : > { %p1372_p2 = pneg %p1371_p1 }
 0x1ff   : > { %p1378_p10 = por %p1377_p7, %p1376_p5 }
 0x201   : > { %p1379_p11 = pnand %p1378_p10, %p1372_p2 }
 0x203   : > { %1382 = shalt.err (!%p1379_p11)
}
 0x204   : > { %1277 = dma.vmem_to_hbm [thread:$0]  (%p1488_p6), %s1866_s29, 32, %s1864_s6, %s1037_s7  }
 0x205 PF: > { %s1078_s26 = sand.u32 1, %s1409_s12   ;;  %p1281_p12 = pnand %p1165_p9, %p1492_p8 }
 0x206   : > { %s1079_s8 = scalar_lea.sflag [#allocation7], %s1078_s26 }
 0x207   : > { %1400 = dma.done.wait (!%p1281_p12), %s1079_s8, 1024  }
 0x208   : > { %1402 = vsyncadd (!%p1281_p12), %s1079_s8, 4294966272  ;;  %s1088_s27 = scalar_lea.sflag [#allocation9], %s1078_s26 }
 0x209   : > { %1404 = dma.done.wait (!%p1281_p12), %s1088_s27, 32  }
 0x20a   : > { %1406 = vsyncadd (!%p1281_p12), %s1088_s27, 4294967264  ;;  %p17_p6 = scmp.ge.s32.totalorder %s1474_s18, 4   ;;  %s1914_s12 = smov %s1413_s13 }
 0x20b   : > { %s1915_s13 = smov %s1417_s14  ;;  %s1916_s14 = smov %s1486_s21 }
 0x20c   : > { %s1917_s15 = smov %s1474_s18  ;;  %19 = sbr.rel (!%p17_p6) target bundleno = 5 (0x5), region = 132 }
 0x213   :  { %1093 = vsyncpa [#allocation7], 1 }
 0x214   :  { %1095 = vsyncpa [#allocation7 + $0x1], 1 }
 0x215   :  { %1096 = vsyncpa [#allocation9], 1 }
 0x216   :  { %1098 = vsyncpa [#allocation9 + $0x1], 1 }

</bundles_post_ra>
